<compile_context>
chip_gen: v6e
topology: v6e:2x2x1
jax: 0.10.0
libtpu: 0.0.40
codegen_flags: <defaults>
</compile_context>

<pallas_src>
import functools

import jax
import jax.numpy as jnp
from jax.experimental import pallas as pl
from jax.experimental.pallas import tpu as pltpu

SMOOTH = 1e-6
LANE = 128
MAX_ROWS_PER_TILE = 2048   # preds block (C=4, 2048, 128) f32 = 4 MiB


def _dice_partials_kernel(preds_ref, labels_ref, out_ref, acc_ref, *,
                          num_ch, rows_per_tile, hw, need_mask):
    # preds_ref:  (1, C, T, 128)  native dtype (f32/bf16/...)
    # labels_ref: (1, T, 128)     native dtype (e.g. int8)
    # out_ref:    (1, 8, 128)     float32 per-image partial-sums slab
    # acc_ref:    (2, T, 128)     float32 accumulator [intersection, preds_sum]
    t = pl.program_id(1)
    num_tiles = pl.num_programs(1)

    @pl.when(t == 0)
    def _():
        acc_ref[...] = jnp.zeros_like(acc_ref)

    # Channel-1 softmax shortcut: prob1 = 1 / (1 + sum_{ch != 1} exp(p_ch - p_1)).
    # Numerically stable (denom >= 1; overflow to inf correctly drives prob1 -> 0).
    p1 = preds_ref[0, 1].astype(jnp.float32)                    # (T, 128)
    denom = jnp.ones_like(p1)                                   # the ch == 1 term: exp(0)
    for ch in range(num_ch):
        if ch == 1:
            continue
        denom = denom + jnp.exp(preds_ref[0, ch].astype(jnp.float32) - p1)
    prob1 = pl.reciprocal(denom, approx=True)                   # (T, 128)

    lab = labels_ref[0].astype(jnp.float32)                     # (T, 128)

    if need_mask:
        # Only the last tile of each image can contain padded / out-of-bounds
        # pixels; keep the hot path mask-free and handle the tail separately.
        is_last = t == num_tiles - 1

        @pl.when(t < num_tiles - 1)
        def _():
            acc_ref[0] += prob1 * lab
            acc_ref[1] += prob1

        @pl.when(is_last)
        def _():
            rid = jax.lax.broadcasted_iota(jnp.int32, (rows_per_tile, LANE), 0)
            lid = jax.lax.broadcasted_iota(jnp.int32, (rows_per_tile, LANE), 1)
            flat = (t * rows_per_tile + rid) * LANE + lid        # index within image
            valid = flat < hw
            acc_ref[0] += jnp.where(valid, prob1 * lab, 0.0)
            acc_ref[1] += jnp.where(valid, prob1, 0.0)
    else:
        acc_ref[0] += prob1 * lab
        acc_ref[1] += prob1

    @pl.when(t == num_tiles - 1)
    def _():
        inter = jnp.sum(acc_ref[0])
        psum = jnp.sum(acc_ref[1])
        # Single full-block, lane-dense store of the two per-image partials
        # (sublane 0 = intersection, sublanes 1.. = preds sum).
        sub = jax.lax.broadcasted_iota(jnp.int32, (1, 8, LANE), 1)
        out_ref[...] = jnp.where(sub == 0, inter, psum)


def dice_loss(preds, labels, smooth=SMOOTH):
    """preds: (N, C, H, W) float (any dtype, C >= 2); labels: (N, H, W) int/bool/float.
    Returns the scalar dice loss, matching the PyTorch DiceLoss.forward."""
    N, C, H, W = preds.shape
    assert C >= 2, "channel-1 softmax shortcut (like the reference) needs C >= 2"
    hw = H * W

    lane_pad = (-hw) % LANE
    if lane_pad == 0:
        # Free contiguous reshapes -- no extra HBM traffic for preds.
        preds_flat = preds.reshape(N, C, hw)
        labels_flat = labels.reshape(N, hw)
        hw_pad = hw
    else:
        # Ragged H*W: pad the flattened pixel axis to a lane multiple (copy,
        # but only in this uncommon case).  Padded pixels are masked in-kernel.
        preds_flat = jnp.pad(preds.reshape(N, C, hw), ((0, 0), (0, 0), (0, lane_pad)))
        labels_flat = jnp.pad(labels.reshape(N, hw), ((0, 0), (0, lane_pad)))
        hw_pad = hw + lane_pad

    rows = hw_pad // LANE
    rows_per_tile = rows if rows <= MAX_ROWS_PER_TILE else MAX_ROWS_PER_TILE
    num_tiles = pl.cdiv(rows, rows_per_tile)
    # Mask only needed when the tile grid over-covers the true pixel count
    # (lane padding and/or a ragged last tile reading past the array edge).
    need_mask = (num_tiles * rows_per_tile * LANE) != hw

    preds_tiled = preds_flat.reshape(N, C, rows, LANE)
    labels_tiled = labels_flat.reshape(N, rows, LANE)

    kernel = functools.partial(
        _dice_partials_kernel,
        num_ch=C, rows_per_tile=rows_per_tile, hw=hw, need_mask=need_mask)

    partials = pl.pallas_call(
        kernel,
        out_shape=jax.ShapeDtypeStruct((N, 8, LANE), jnp.float32),
        grid_spec=pltpu.PrefetchScalarGridSpec(
            num_scalar_prefetch=0,
            grid=(N, num_tiles),
            in_specs=[
                pl.BlockSpec((1, C, rows_per_tile, LANE),
                             lambda n, t: (n, 0, t, 0)),
                pl.BlockSpec((1, rows_per_tile, LANE),
                             lambda n, t: (n, t, 0)),
            ],
            out_specs=pl.BlockSpec((1, 8, LANE), lambda n, t: (n, 0, 0)),
            scratch_shapes=[pltpu.VMEM((2, rows_per_tile, LANE), jnp.float32)],
        ),
        compiler_params=pltpu.CompilerParams(
            dimension_semantics=("parallel", "arbitrary"),
            vmem_limit_bytes=32 * 1024 * 1024),
    )(preds_tiled, labels_tiled)

    # Tiny cross-image combine + dice formula in the wrapper; labels sum is
    # computed here too (labels are ~1 B/pixel, the extra XLA pass is noise).
    inter = jnp.sum(partials[:, 0, 0])
    psum = jnp.sum(partials[:, 1, 0])
    lsum = jnp.sum(labels.astype(jnp.float32))
    dice = (2.0 * inter + smooth) / (psum + lsum + smooth)
    return 1.0 - dice


def dice_loss_ref(preds, labels, smooth=SMOOTH):
    p = jax.nn.softmax(preds.astype(jnp.float32), axis=1)[:, 1, :, :]
    l = labels.astype(jnp.float32)
    inter = jnp.sum(p * l)
    union = jnp.sum(p) + jnp.sum(l)
    dice = (2.0 * inter + smooth) / (union + smooth)
    return 1.0 - dice


if __name__ == "__main__":
    key = jax.random.PRNGKey(0)
    k1, k2 = jax.random.split(key)
    N, C, H, W = 2, 4, 16, 16
    preds = jax.random.normal(k1, (N, C, H, W), dtype=jnp.float32)
    # Labels kept narrow (int8): 1 B/pixel of HBM read inside the kernel.
    labels = jax.random.bernoulli(k2, 0.5, (N, H, W)).astype(jnp.int8)

    loss = dice_loss(preds, labels)
    jax.block_until_ready(loss)

    ref = dice_loss_ref(preds, labels)
    # pl.reciprocal(approx=True) introduces ~2^-12 relative error in prob1.
    assert jnp.allclose(loss, ref, atol=2e-3, rtol=2e-3), (loss, ref)
    print("KERNEL_OK")
</pallas_src>

<mosaic_0001>
module attributes {stable_mosaic.version = 11 : i64} {
  func.func @_dice_partials_kernel(%arg0: i32, %arg1: i32, %arg2: memref<1x4x2x128xf32, #tpu.memory_space<vmem>>, %arg3: memref<1x2x128xi8, #tpu.memory_space<vmem>>, %arg4: memref<1x8x128xf32, #tpu.memory_space<vmem>>, %arg5: memref<2x2x128xf32, #tpu.memory_space<vmem>>) attributes {dimension_semantics = [#tpu.dimension_semantics<parallel>, #tpu.dimension_semantics<arbitrary>], iteration_bounds = array<i64: 2, 1>, scalar_prefetch = 0 : i64, scratch_operands = 1 : i64, tpu.core_type = #tpu.core_type<tc>, window_params = [{transform_indices = @transform_0, window_bounds = array<i64: 1, 4, 2, 128>}, {transform_indices = @transform_1, window_bounds = array<i64: 1, 2, 128>}, {transform_indices = @transform_2, window_bounds = array<i64: 1, 8, 128>}]} {
    %c0_i32 = arith.constant 0 : i32
    %0 = arith.cmpi eq, %arg1, %c0_i32 : i32
    %1 = arith.extui %0 : i1 to i32
    %c0_i32_0 = arith.constant 0 : i32
    %2 = arith.cmpi ne, %1, %c0_i32_0 : i32
    scf.if %2 {
      %cst_30 = arith.constant 0.000000e+00 : f32
      %41 = vector.broadcast %cst_30 : f32 to vector<2x2x128xf32>
      %c0_31 = arith.constant 0 : index
      %c0_32 = arith.constant 0 : index
      %c0_33 = arith.constant 0 : index
      %42 = vector.load %arg5[%c0_31, %c0_32, %c0_33] : memref<2x2x128xf32, #tpu.memory_space<vmem>>, vector<2x2x128xf32>
      tpu.vector_store %arg5[%c0_31, %c0_32, %c0_33], %41 {strides = array<i32>} : memref<2x2x128xf32, #tpu.memory_space<vmem>>, vector<2x2x128xf32>,
    } else {
    }
    %c0 = arith.constant 0 : index
    %c1 = arith.constant 1 : index
    %c0_1 = arith.constant 0 : index
    %c0_2 = arith.constant 0 : index
    %3 = vector.load %arg2[%c0, %c1, %c0_1, %c0_2] : memref<1x4x2x128xf32, #tpu.memory_space<vmem>>, vector<1x1x2x128xf32>
    %4 = vector.shape_cast %3 : vector<1x1x2x128xf32> to vector<2x128xf32>
    %cst = arith.constant 1.000000e+00 : f32
    %5 = vector.broadcast %cst : f32 to vector<2x128xf32>
    %c0_3 = arith.constant 0 : index
    %c0_4 = arith.constant 0 : index
    %c0_5 = arith.constant 0 : index
    %c0_6 = arith.constant 0 : index
    %6 = vector.load %arg2[%c0_3, %c0_4, %c0_5, %c0_6] : memref<1x4x2x128xf32, #tpu.memory_space<vmem>>, vector<1x1x2x128xf32>
    %7 = vector.shape_cast %6 : vector<1x1x2x128xf32> to vector<2x128xf32>
    %8 = arith.subf %7, %4 : vector<2x128xf32>
    %9 = math.exp %8 : vector<2x128xf32>
    %10 = arith.addf %5, %9 : vector<2x128xf32>
    %c0_7 = arith.constant 0 : index
    %c2 = arith.constant 2 : index
    %c0_8 = arith.constant 0 : index
    %c0_9 = arith.constant 0 : index
    %11 = vector.load %arg2[%c0_7, %c2, %c0_8, %c0_9] : memref<1x4x2x128xf32, #tpu.memory_space<vmem>>, vector<1x1x2x128xf32>
    %12 = vector.shape_cast %11 : vector<1x1x2x128xf32> to vector<2x128xf32>
    %13 = arith.subf %12, %4 : vector<2x128xf32>
    %14 = math.exp %13 : vector<2x128xf32>
    %15 = arith.addf %10, %14 : vector<2x128xf32>
    %c0_10 = arith.constant 0 : index
    %c3 = arith.constant 3 : index
    %c0_11 = arith.constant 0 : index
    %c0_12 = arith.constant 0 : index
    %16 = vector.load %arg2[%c0_10, %c3, %c0_11, %c0_12] : memref<1x4x2x128xf32, #tpu.memory_space<vmem>>, vector<1x1x2x128xf32>
    %17 = vector.shape_cast %16 : vector<1x1x2x128xf32> to vector<2x128xf32>
    %18 = arith.subf %17, %4 : vector<2x128xf32>
    %19 = math.exp %18 : vector<2x128xf32>
    %20 = arith.addf %15, %19 : vector<2x128xf32>
    %21 = tpu.reciprocal %20 {approx = true} : vector<2x128xf32> -> vector<2x128xf32>
    %c0_13 = arith.constant 0 : index
    %c0_14 = arith.constant 0 : index
    %c0_15 = arith.constant 0 : index
    %22 = vector.load %arg3[%c0_13, %c0_14, %c0_15] : memref<1x2x128xi8, #tpu.memory_space<vmem>>, vector<1x2x128xi8>
    %23 = vector.shape_cast %22 : vector<1x2x128xi8> to vector<2x128xi8>
    %24 = arith.sitofp %23 : vector<2x128xi8> to vector<2x128xf32>
    %c0_16 = arith.constant 0 : index
    %c0_17 = arith.constant 0 : index
    %c0_18 = arith.constant 0 : index
    %25 = vector.load %arg5[%c0_16, %c0_17, %c0_18] : memref<2x2x128xf32, #tpu.memory_space<vmem>>, vector<1x2x128xf32>
    %26 = vector.shape_cast %25 : vector<1x2x128xf32> to vector<2x128xf32>
    %27 = arith.mulf %21, %24 : vector<2x128xf32>
    %28 = arith.addf %26, %27 : vector<2x128xf32>
    %c0_19 = arith.constant 0 : index
    %c0_20 = arith.constant 0 : index
    %c0_21 = arith.constant 0 : index
    %29 = vector.load %arg5[%c0_19, %c0_20, %c0_21] : memref<2x2x128xf32, #tpu.memory_space<vmem>>, vector<1x2x128xf32>
    %30 = vector.shape_cast %29 : vector<1x2x128xf32> to vector<2x128xf32>
    %31 = vector.shape_cast %28 : vector<2x128xf32> to vector<1x2x128xf32>
    tpu.vector_store %arg5[%c0_19, %c0_20, %c0_21], %31 {strides = array<i32>} : memref<2x2x128xf32, #tpu.memory_space<vmem>>, vector<1x2x128xf32>,
    %c1_22 = arith.constant 1 : index
    %c0_23 = arith.constant 0 : index
    %c0_24 = arith.constant 0 : index
    %32 = vector.load %arg5[%c1_22, %c0_23, %c0_24] : memref<2x2x128xf32, #tpu.memory_space<vmem>>, vector<1x2x128xf32>
    %33 = vector.shape_cast %32 : vector<1x2x128xf32> to vector<2x128xf32>
    %34 = arith.addf %33, %21 : vector<2x128xf32>
    %c1_25 = arith.constant 1 : index
    %c0_26 = arith.constant 0 : index
    %c0_27 = arith.constant 0 : index
    %35 = vector.load %arg5[%c1_25, %c0_26, %c0_27] : memref<2x2x128xf32, #tpu.memory_space<vmem>>, vector<1x2x128xf32>
    %36 = vector.shape_cast %35 : vector<1x2x128xf32> to vector<2x128xf32>
    %37 = vector.shape_cast %34 : vector<2x128xf32> to vector<1x2x128xf32>
    tpu.vector_store %arg5[%c1_25, %c0_26, %c0_27], %37 {strides = array<i32>} : memref<2x2x128xf32, #tpu.memory_space<vmem>>, vector<1x2x128xf32>,
    %c0_i32_28 = arith.constant 0 : i32
    %38 = arith.cmpi eq, %arg1, %c0_i32_28 : i32
    %39 = arith.extui %38 : i1 to i32
    %c0_i32_29 = arith.constant 0 : i32
    %40 = arith.cmpi ne, %39, %c0_i32_29 : i32
    scf.if %40 {
      %c0_30 = arith.constant 0 : index
      %c0_31 = arith.constant 0 : index
      %c0_32 = arith.constant 0 : index
      %41 = vector.load %arg5[%c0_30, %c0_31, %c0_32] : memref<2x2x128xf32, #tpu.memory_space<vmem>>, vector<1x2x128xf32>
      %42 = vector.shape_cast %41 : vector<1x2x128xf32> to vector<2x128xf32>
      %43 = vector.shape_cast %42 : vector<2x128xf32> to vector<1x2x128xf32>
      %cst_33 = arith.constant dense<0.000000e+00> : vector<1xf32>
      %44 = vector.multi_reduction <add>, %43, %cst_33 [1, 2] : vector<1x2x128xf32> to vector<1xf32>
      %45 = vector.shape_cast %44 : vector<1xf32> to vector<1x1x1xf32>
      %46 = vector.extract %45[0, 0, 0] : f32 from vector<1x1x1xf32>
      %c1_34 = arith.constant 1 : index
      %c0_35 = arith.constant 0 : index
      %c0_36 = arith.constant 0 : index
      %47 = vector.load %arg5[%c1_34, %c0_35, %c0_36] : memref<2x2x128xf32, #tpu.memory_space<vmem>>, vector<1x2x128xf32>
      %48 = vector.shape_cast %47 : vector<1x2x128xf32> to vector<2x128xf32>
      %49 = vector.shape_cast %48 : vector<2x128xf32> to vector<1x2x128xf32>
      %cst_37 = arith.constant dense<0.000000e+00> : vector<1xf32>
      %50 = vector.multi_reduction <add>, %49, %cst_37 [1, 2] : vector<1x2x128xf32> to vector<1xf32>
      %51 = vector.shape_cast %50 : vector<1xf32> to vector<1x1x1xf32>
      %52 = vector.extract %51[0, 0, 0] : f32 from vector<1x1x1xf32>
      %53 = tpu.iota {dimensions = array<i32: 1>} : vector<1x8x128xi32>
      %c0_i32_38 = arith.constant 0 : i32
      %54 = vector.broadcast %c0_i32_38 : i32 to vector<1x8x128xi32>
      %55 = arith.cmpi eq, %53, %54 : vector<1x8x128xi32>
      %56 = vector.broadcast %46 : f32 to vector<1x8x128xf32>
      %57 = vector.broadcast %52 : f32 to vector<1x8x128xf32>
      %58 = arith.select %55, %56, %57 : vector<1x8x128xi1>, vector<1x8x128xf32>
      %c0_39 = arith.constant 0 : index
      %c0_40 = arith.constant 0 : index
      %c0_41 = arith.constant 0 : index
      %59 = vector.load %arg4[%c0_39, %c0_40, %c0_41] : memref<1x8x128xf32, #tpu.memory_space<vmem>>, vector<1x8x128xf32>
      tpu.vector_store %arg4[%c0_39, %c0_40, %c0_41], %58 {strides = array<i32>} : memref<1x8x128xf32, #tpu.memory_space<vmem>>, vector<1x8x128xf32>,
    } else {
    }
    return
  }
  func.func @transform_0(%arg0: i32, %arg1: i32) -> (i32, i32, i32, i32) {
    %c0_i32 = arith.constant 0 : i32
    %c0_i32_0 = arith.constant 0 : i32
    %c0_i32_1 = arith.constant 0 : i32
    return %arg0, %c0_i32, %arg1, %c0_i32_0 : i32, i32, i32, i32
  }
  func.func @transform_1(%arg0: i32, %arg1: i32) -> (i32, i32, i32) {
    %c0_i32 = arith.constant 0 : i32
    %c0_i32_0 = arith.constant 0 : i32
    return %arg0, %arg1, %c0_i32 : i32, i32, i32
  }
  func.func @transform_2(%arg0: i32, %arg1: i32) -> (i32, i32, i32) {
    %c0_i32 = arith.constant 0 : i32
    %c0_i32_0 = arith.constant 0 : i32
    %c0_i32_1 = arith.constant 0 : i32
    return %arg0, %c0_i32, %c0_i32_0 : i32, i32, i32
  }
}

</mosaic_0001>

<bundles_post_ra>
// kernel: tpu_custom_call.1
= control target key start
LH: loop header
LB: loop body
LE: loop exit
PB: predicated region body
PF: predicated region fallthrough
CT: control target
= control target key end

     0   :  { %7 = vsyncpa [#allocation4], 0  ;;  %s835_s0 = inlined_call_operand.hbm [shape: f32[2,4,2,128], index: 0, kind: input, shape index: {}]   ;;  %s836_s1 = inlined_call_operand.hbm [shape: s8[2,2,128], index: 1, kind: input, shape index: {}]   ;;  %s837_s2 = inlined_call_operand.hbm [shape: f32[2,8,128], index: 2, kind: output, shape index: {}]  }
   0x1   :  { %9 = vsyncpa [#allocation4 + $0x1], 0 }
   0x2   :  { %10 = vsyncpa [#allocation7], 0 }
   0x3   :  { %12 = vsyncpa [#allocation7 + $0x1], 0 }
   0x4   :  { %13 = vsyncpa [#allocation5], 0 }
   0x5   :  { %15 = vsyncpa [#allocation5 + $0x1], 0  ;;  %s663_s9 = smov 0   ;;  %s665_s10 = smov 0  }
   0x6   :  { %s667_s11 = smov 0   ;;  %s669_s12 = smov 0  }
   0x7   :  { %s671_s13 = smov 0   ;;  %s673_s14 = smov 0  }
   0x8 LB: > { %s399_s15 = sadd.s32 4294967295, %s640_s14   ;;  %s400_s16 = sadd.s32 4294967294, %s640_s14   ;;  %s640_s14 = sphi %s673_s14, %s21_s14   ;;  %s636_s13 = sphi %s671_s13, %s848_s13   ;;  %s632_s12 = sphi %s669_s12, %s847_s12   ;;  %s628_s11 = sphi %s667_s11, %s846_s11   ;;  %s624_s10 = sphi %s665_s10, %s845_s10   ;;  %s620_s9 = sphi %s663_s9, %s844_s9  }
   0x9   : > { %s33_s17 = sadd.s32 1, %s636_s13  ;;  %s42_s18 = sadd.s32 1, %s628_s11 }
   0xa   : > { %p35_p0 = scmp.ge.s32.totalorder %s33_s17, 2  ;;  %p49_p1 = scmp.ne.s32.totalorder %s628_s11, %s624_s10 }
   0xb   : > { %p50_p2 = scmp.eq.s32.totalorder %s640_s14, 0  ;;  %p55_p3 = scmp.ne.s32.totalorder %s624_s10, %s620_s9 }
   0xc   : > { %s850_s17 = smov (%p35_p0, %s33_s17), 0  ;;  %p56_p5 = scmp.eq.s32.totalorder %s399_s15, 0 }
   0xd   : > { %p704_p4 = por %p50_p2, %p49_p1  ;;  %s37_s20 = ssub.s32 %s636_s13, %s850_s17 }
   0xe   : > { %p107_p6 = scmp.eq.s32.totalorder %s399_s15, 1  ;;  %p40_p7 = scmp.eq.s32.totalorder %s37_s20, 0 }
   0xf   : > { %p710_p8 = por %p56_p5, %p55_p3  ;;  %p113_p10 = scmp.eq.s32.totalorder %s400_s16, 1 }
  0x10   : > { %p714_p9 = por %p107_p6, %p49_p1  ;;  %p402_p12 = scmp.ge.s32.totalorder %s640_s14, 2 }
  0x11   : > { %s719_s23 = scalar_select %p40_p7, %s628_s11, %s42_s18  }
  0x12   : > { %p721_p11 = por %p113_p10, %p55_p3  ;;  %p439_p13 = scmp.lt.s32.totalorder %s640_s14, 2 }
  0x13   : > { %s728_s25 = sand.u32 1, %s628_s11   ;;  %s417_s27 = sshll.u32 %s636_s13, 7 }
  0x14   : > { %s403_s26 = sshll.u32 %s728_s25, 3  ;;  %s144_s30 = scalar_lea.hbm %s835_s0, %s417_s27 }
  0x15   : > { %s137_s3 = scalar_lea.vmem [#allocation3], %s403_s26  ;;  %p737_p0 = pnand %p439_p13, %p704_p4 }
  0x16   : > { %s145_s4 = sshll.u32 %s137_s3, 4  ;;  %p407_p1 = scmp.ge.s32.totalorder %s640_s14, 1  ;;  %s146_s4 = int_to_ptr.vmem [resolvable:$true] %s145_s4 }
  0x17   : > { %s134_s6 = scalar_lea.sflag [#allocation4], %s728_s25  ;;  %p502_p2 = pneg %p737_p0 }
  0x18   : > { %s513_s7 = scalar_lea.vmem %s146_s4, 128  ;;  %s642_s8 = smov [#allocation3]  }
  0x19   : > { %p514_p3 = scmp.ne.s32.totalorder %s146_s4, %s513_s7  ;;  %s518_s15 = sshll.u32 %s642_s8, 4  ;;  %s519_s15 = int_to_ptr.vmem [resolvable:$false] %s518_s15 }
  0x1a   : > { %s520_s16 = scalar_lea.vmem %s519_s15, 256  ;;  %p521_p4 = scmp.lt.s32.totalorder %s146_s4, %s519_s15 }
  0x1b   : > { %p516_p5 = pnand %p514_p3, %p502_p2  ;;  %p522_p7 = scmp.lt.s32.totalorder %s520_s16, %s513_s7 }
  0x1d   : > { %p517_p6 = pneg %p516_p5  ;;  %p523_p10 = por %p522_p7, %p521_p4 }
  0x1f   : > { %p524_p13 = pnand %p523_p10, %p517_p6 }
  0x21   : > { %527 = shalt.err (!%p524_p13)
}
  0x22   : > { %s643_s18 = smov 32   ;;  %s644_s19 = smov 2  }
  0x23   : > { %431 = dma.hbm_to_vmem [thread:$0]  (!%p737_p0), %s144_s30, 128, %s146_s4, %s134_s6, %s643_s18, %s643_s18, %s644_s19  }
  0x24   : > { %p171_p3 = scmp.lt.s32.totalorder %s640_s14, 3  ;;  %s406_s20 = sshll.u32 %s636_s13, 4 }
  0x25   : > { %s164_s29 = scalar_lea.hbm %s836_s1, %s406_s20  ;;  %s158_s3 = scalar_lea.vmem [#allocation6], %s728_s25 }
  0x26   : > { %p754_p5 = pnand %p407_p1, %p171_p3  ;;  %s166_s7 = sshll.u32 %s158_s3, 4  ;;  %s167_s7 = int_to_ptr.vmem [resolvable:$true] %s166_s7 }
  0x27   : > { %s156_s8 = scalar_lea.sflag [#allocation7], %s728_s25  ;;  %s541_s15 = scalar_lea.vmem %s167_s7, 16 }
  0x28   : > { %p542_p6 = scmp.ne.s32.totalorder %s167_s7, %s541_s15  ;;  %s645_s30 = smov [#allocation6]  }
  0x29   : > { %s546_s4 = sshll.u32 %s645_s30, 4  ;;  %s547_s4 = int_to_ptr.vmem [resolvable:$false] %s546_s4 }
  0x2a   : > { %p544_p4 = pnand %p542_p6, %p502_p2  ;;  %s548_s6 = scalar_lea.vmem %s547_s4, 32 }
  0x2b   : > { %p549_p1 = scmp.lt.s32.totalorder %s167_s7, %s547_s4  ;;  %p550_p10 = scmp.lt.s32.totalorder %s548_s6, %s541_s15 }
  0x2c   : > { %p545_p7 = pneg %p544_p4 }
  0x2d   : > { %p551_p13 = por %p550_p10, %p549_p1 }
  0x2f   : > { %p552_p3 = pnand %p551_p13, %p545_p7 }
  0x31   : > { %555 = shalt.err (!%p552_p3)
}
  0x32   : > { %434 = dma.hbm_to_vmem [thread:$0]  (!%p737_p0), %s164_s29, 16, %s167_s7, %s156_s8  }
  0x33   : > { %175 = sbr.rel (%p754_p5) target bundleno = 330 (0x14a), region = 28  ;;  %s771_s25 = sand.u32 (!%p754_p5), 1, %s624_s10  }
  0x34   : > { %s408_s16 = sshll.u32 (!%p754_p5), %s771_s25, 3  ;;  %s178_s18 = scalar_lea.sflag (!%p754_p5), [#allocation4], %s771_s25 }
  0x35   : > { %s181_s19 = scalar_lea.vmem (!%p754_p5), [#allocation3], %s408_s16 }
  0x38   : > { %607 = dma.done.wait (%p710_p8), %s178_s18, 128  }
  0x39   : > { %609 = vsyncadd (%p710_p8), %s178_s18, 4294967168  ;;  %s187_s5 = scalar_lea.sflag [#allocation7], %s771_s25  ;;  %s189_s20 = scalar_lea.vmem [#allocation6], %s771_s25 }
  0x3a   : > { %611 = dma.done.wait (%p710_p8), %s187_s5, 16  }
  0x3b   : > { %613 = vsyncadd (%p710_p8), %s187_s5, 4294967280  ;;  %v646_v0 = vmov 0.0   ;;  %v410_v1 = vld [vmem:[%s181_s19 + $0x2] sm:$0x3]  ;;  %v222_v2 = vld [vmem:[%s181_s19] sm:$0x3]  ;;  %v277_v44 = vlaneseq }
  0x3c   : > { %218 = vst [vmem:[#allocation2] sm:$0x3] %v646_v0  ;;  %219 = vst [vmem:[#allocation2 + $0x2] sm:$0x3] %v646_v0  ;;  %v411_v3 = vld [vmem:[%s181_s19 + $0x4] sm:$0x3]  ;;  %v223_v4 = vsub.f32 %v222_v2, %v410_v1 }
  0x3d   : > { %v229_v5 = vsub.f32 %v411_v3, %v410_v1  ;;  %v412_v6 = vld [vmem:[%s181_s19 + $0x6] sm:$0x3]  ;;  %v240_v17 = vld [vmem:[%s189_s20] sm:$0x1]  ;;  %vm255_vm0 = vcmask 1041408   ;;  %v278_v45 = vshrl.u32 %v277_v44, 7 }
  0x3e   : > { %v235_v7 = vsub.f32 %v412_v6, %v410_v1  ;;  %v224_v8 = vmul.f32 1.442695, %v223_v4  ;;  %v241_v18 = vunpack.c.0.s8 %v240_v17  ;;  %s414_s21 = sshll.u32 %s632_s12, 7  ;;  %s213_s27 = scalar_lea.vmem [#allocation8], %s408_s16 }
  0x3f   : > { %v230_v9 = vmul.f32 1.442695, %v229_v5  ;;  %s298_s28 = sshll.u32 %s213_s27, 4  ;;  %vm279_vm1 = vcmp.eq.s32.totalorder %v278_v45, 0  ;;  %s793_s8 = scalar_lea.hbm %s837_s2, %s414_s21  ;;  %s299_s28 = int_to_ptr.vmem [resolvable:$true] %s298_s28 }
  0x40   : > { %v236_v10 = vmul.f32 1.442695, %v235_v7  ;;  %492 = vpow2.f32 %v224_v8  ;;  %v242_v19 = vcvt.s32.f32 %v241_v18  ;;  %s285_s15 = scalar_lea.sflag [#allocation5], %s771_s25  ;;  %s556_s30 = scalar_lea.vmem %s299_s28, 128 }
  0x41   : > { %494 = vpow2.f32 %v230_v9  ;;  %p557_p8 = scmp.ne.s32.totalorder %s299_s28, %s556_s30  ;;  %s647_s12 = smov [#allocation8]  }
  0x42   : > { %496 = vpow2.f32 %v236_v10  ;;  %s560_s4 = sshll.u32 %s647_s12, 4  ;;  %s561_s4 = int_to_ptr.vmem [resolvable:$false] %s560_s4 }
  0x43   : > { %v248_v20 = vld [vmem:[#allocation2 + $0x2] sm:$0x3]  ;;  %v243_v22 = vld [vmem:[#allocation2] sm:$0x3]  ;;  %p558_p0 = pnand %p557_p8, %p714_p9  ;;  %s562_s6 = scalar_lea.vmem %s561_s4, 256 }
  0x44   : > { %p563_p5 = scmp.lt.s32.totalorder %s299_s28, %s561_s4  ;;  %p564_p6 = scmp.lt.s32.totalorder %s562_s6, %s556_s30 }
  0x45   : > { %p559_p2 = pneg %p558_p0 }
  0x46   : > { %p565_p4 = por %p564_p6, %p563_p5 }
  0x48   : > { %p566_p7 = pnand %p565_p4, %p559_p2 }
  0x4d   : > { %v493_v11 = vpop.eup %492 }
  0x4e   : > { %v495_v12 = vpop.eup %494  ;;  %v226_v13 = vadd.f32 1.0, %v493_v11 }
  0x4f   : > { %v497_v14 = vpop.eup %496 }
  0x50   : > { %v232_v15 = vadd.f32 %v495_v12, %v226_v13 }
  0x52   : > { %v238_v16 = vadd.f32 %v497_v14, %v232_v15 }
  0x54   : > { %498 = vrcp.f32 %v238_v16 }
  0x61   : > { %v499_v21 = vpop.eup %498 }
  0x62   : > { %v244_v23 = vmul.f32 %v499_v21, %v242_v19  ;;  %v249_v24 = vadd.f32 %v499_v21, %v248_v20 }
  0x64   : > { %v245_v25 = vadd.f32 %v244_v23, %v243_v22  ;;  %250 = vst [vmem:[#allocation2 + $0x2] sm:$0x3] %v249_v24 }
  0x66   : > { %246 = vst [vmem:[#allocation2] sm:$0x3] %v245_v25 }
  0x6b   : > { %v266_v27 = vld [vmem:[#allocation2 + $0x2] sm:$0x3] }
  0x6c   : > { %v267_v29 = vsel %vm255_vm0, %v266_v27, 0.0 }
  0x6d   : > { %v254_v26 = vld [vmem:[#allocation2] sm:$0x3] }
  0x6e   : > { %v256_v28 = vsel %vm255_vm0, %v254_v26, 0.0 }
  0x6f   : > { %257 = vadd.xlane.f32.xlu0 %v256_v28 }
  0x73   : > { %268 = vadd.xlane.f32.xlu0 %v267_v29 }
  0xf8   : > { %v258_v30 = vpop.xlane.xlu0 %257 }
  0xf9   : > { %v259_v31 = vrot.slane %v258_v30, 4 }
  0xfb   : > { %v260_v32 = vadd.f32 %v259_v31, %v258_v30 }
  0xfc   : > { %v269_v33 = vpop.xlane.xlu0 %268 }
  0xfd   : > { %v261_v34 = vrot.slane %v260_v32, 2  ;;  %v270_v35 = vrot.slane %v269_v33, 4 }
  0xff   : > { %v271_v36 = vadd.f32 %v270_v35, %v269_v33  ;;  %v262_v37 = vadd.f32 %v261_v34, %v260_v32 }
 0x101   : > { %v272_v38 = vrot.slane %v271_v36, 2  ;;  %v263_v39 = vrot.slane %v262_v37, 1 }
 0x103   : > { %v273_v40 = vadd.f32 %v272_v38, %v271_v36  ;;  %v264_v41 = vadd.f32 %v263_v39, %v262_v37 }
 0x105   : > { %418 = vpush %v264_v41  ;;  %v274_v42 = vrot.slane %v273_v40, 1 }
 0x107   : > { %v275_v43 = vadd.f32 %v274_v42, %v273_v40 }
 0x109   : > { %420 = vpush %v275_v43 }
 0x136   : > { %s419_s26 = spop %418 }
 0x137   : > { %v280_v46 = vstv %s419_s26 }
 0x13a   : > { %s421_s29 = spop %420 }
 0x13b   : > { %v281_v47 = vstv %s421_s29 }
 0x13c   : > { %v282_v48 = vsel %vm279_vm1, %v280_v46, %v281_v47 }
 0x13d   : > { %283 = vst [vmem:[%s213_s27] sm:$0xff] %v282_v48 }
 0x13e   : > { %569 = shalt.err (!%p566_p7)
}
 0x13f   : > { %s570_s16 = scalar_lea.hbm %s793_s8, 128  ;;  %s574_s19 = scalar_lea.hbm %s837_s2, 256 }
 0x140   : > { %p571_p1 = scmp.ne.s32.totalorder %s793_s8, %s570_s16  ;;  %p575_p3 = scmp.lt.s32.totalorder %s793_s8, %s837_s2 }
 0x141   : > { %p576_p8 = scmp.lt.s32.totalorder %s574_s19, %s570_s16 }
 0x142   : > { %p572_p10 = pnand %p571_p1, %p714_p9 }
 0x143   : > { %p577_p0 = por %p576_p8, %p575_p3 }
 0x144   : > { %p573_p13 = pneg %p572_p10 }
 0x146   : > { %p578_p2 = pnand %p577_p0, %p573_p13 }
 0x148   : > { %581 = shalt.err (!%p578_p2)
}
 0x149   : > { %426 = dma.vmem_to_hbm [thread:$0]  (%p714_p9), %s299_s28, 128, %s793_s8, %s285_s15  }
 0x14a PF: > { %s310_s21 = sand.u32 1, %s620_s9   ;;  %p436_p5 = pnand %p402_p12, %p721_p11 }
 0x14b   : > { %s311_s26 = scalar_lea.sflag [#allocation5], %s310_s21 }
 0x14c   : > { %p437_p6 = pneg %p436_p5 }
 0x14e   : > { %615 = dma.done.wait (%p437_p6), %s311_s26, 128  }
 0x14f   : > { %617 = vsyncadd (%p437_p6), %s311_s26, 4294967168  ;;  %s21_s14 = sadd.s32 1, %s640_s14   ;;  %s844_s9 = smov %s624_s10 }
 0x150   : > { %p18_p4 = scmp.ge.s32.totalorder %s21_s14, 4   ;;  %s845_s10 = smov %s628_s11 }
 0x151   : > { %s846_s11 = smov %s719_s23  ;;  %s847_s12 = smov %s636_s13 }
 0x152   : > { %s848_s13 = smov %s850_s17  ;;  %20 = sbr.rel (!%p18_p4) target bundleno = 8 (0x8), region = 98 }
 0x157   :  { %316 = vsyncpa [#allocation4], 1 }
 0x158   :  { %318 = vsyncpa [#allocation4 + $0x1], 1 }
 0x159   :  { %319 = vsyncpa [#allocation7], 1 }
 0x15a   :  { %321 = vsyncpa [#allocation7 + $0x1], 1 }
 0x15b   :  { %322 = vsyncpa [#allocation5], 1 }
 0x15c   :  { %324 = vsyncpa [#allocation5 + $0x1], 1 }

</bundles_post_ra>
